<compile_context>
chip_gen: v7x
topology: tpu7x:2x2x1
jax: 0.10.0
libtpu: 0.0.40
codegen_flags: <defaults>
</compile_context>

<pallas_src>
import functools

import numpy as np
import jax
import jax.numpy as jnp
from jax import lax
from jax.experimental import pallas as pl
from jax.experimental.pallas import tpu as pltpu


def _round_up(x, m):
    return ((x + m - 1) // m) * m


def _simclr_kernel(lab_r_ref, lab_c_ref, feat_r_ref, feat_c_ref, out_ref,
                   xrow_ref, m_ref, l_ref, pos_ref, *, inv_t, n_valid):
    i = pl.program_id(0)          # row tile (parallel)
    j = pl.program_id(1)          # column tile (reduction axis, last)
    tm = feat_r_ref.shape[0]
    tn = feat_c_ref.shape[0]
    neg_big = jnp.float32(-1e30)

    @pl.when(j == 0)
    def _init():
        # L2-normalize the row block in f32, fold 1/T into this operand,
        # cast to bf16 for the MXU and cache it for all column tiles.
        xr = feat_r_ref[...]
        ssq = jnp.sum(xr * xr, axis=1, keepdims=True)
        scale = lax.rsqrt(jnp.maximum(ssq, 1e-24)) * inv_t
        xrow_ref[...] = (xr * scale).astype(jnp.bfloat16)
        m_ref[...] = jnp.full_like(m_ref, neg_big)
        l_ref[...] = jnp.zeros_like(l_ref)
        pos_ref[...] = jnp.zeros_like(pos_ref)

    # Normalize the column block (f32 math, bf16 MXU operand, unscaled).
    xc = feat_c_ref[...]
    ssq_c = jnp.sum(xc * xc, axis=1, keepdims=True)
    xc_bf = (xc * lax.rsqrt(jnp.maximum(ssq_c, 1e-24))).astype(jnp.bfloat16)

    # logits tile = (xn_rows / T) @ xn_cols.T, f32 accumulation on the MXU.
    logits = lax.dot_general(
        xrow_ref[...], xc_bf, (((1,), (1,)), ((), ())),
        preferred_element_type=jnp.float32)                       # (tm, tn)

    # Per-tile global indices (small per-tile iotas only).
    row_g = i * tm + lax.broadcasted_iota(jnp.int32, (tm, tn), 0)
    col_g = j * tn + lax.broadcasted_iota(jnp.int32, (tm, tn), 1)
    valid = (row_g != col_g) & (col_g < n_valid)      # off-diagonal & un-padded

    same = lab_r_ref[...] == lab_c_ref[...]           # (tm,1)==(1,tn) -> (tm,tn)
    pos_mask = same & valid

    # Positive logit: exactly one same-class off-diagonal entry per row in a
    # standard 2-view batch, so summing the masked logits recovers it.
    pos_ref[...] += jnp.sum(jnp.where(pos_mask, logits, 0.0),
                            axis=1, keepdims=True)

    # Online (flash-style) logsumexp over all valid columns.
    masked = jnp.where(valid, logits, neg_big)
    m_prev = m_ref[...]
    m_new = jnp.maximum(m_prev, jnp.max(masked, axis=1, keepdims=True))
    l_ref[...] = (l_ref[...] * jnp.exp(m_prev - m_new)
                  + jnp.sum(jnp.exp(masked - m_new), axis=1, keepdims=True))
    m_ref[...] = m_new

    @pl.when(j == pl.num_programs(1) - 1)
    def _finalize():
        lse = m_ref[...] + jnp.log(l_ref[...])
        out_ref[...] = lse - pos_ref[...]             # per-row CE loss, target 0

    # TODO(synk): pdb.set_trace() in the reference module is debugging-only and
    # has no kernel equivalent.


def simclr_loss(features, labels, temperature=0.07):
    features = jnp.asarray(features, jnp.float32)
    labels = jnp.asarray(labels, jnp.int32)
    N, D = features.shape

    # Lane/sublane-aligned padding and tile selection.
    D_pad = _round_up(D, 128)
    if N <= 256:
        tm = tn = _round_up(N, 8)          # single tile per axis
    else:
        tm = tn = 256                      # MXU-friendly on v5e/v6e/v7x
    N_pad = _round_up(N, tm)

    f = jnp.zeros((N_pad, D_pad), jnp.float32).at[:N, :D].set(features)
    lab = jnp.full((N_pad,), -1, jnp.int32).at[:N].set(labels)   # -1 = padding
    lab_rows = lab.reshape(N_pad, 1)   # tiny (tm,1) block per row tile
    lab_cols = lab.reshape(1, N_pad)   # lane-dense (1,tn) block per col tile

    grid = (N_pad // tm, N_pad // tn)
    kernel = functools.partial(_simclr_kernel,
                               inv_t=float(1.0 / temperature),
                               n_valid=int(N))

    per_row = pl.pallas_call(
        kernel,
        out_shape=jax.ShapeDtypeStruct((N_pad, 1), jnp.float32),
        grid_spec=pltpu.PrefetchScalarGridSpec(
            num_scalar_prefetch=0,
            grid=grid,
            in_specs=[
                pl.BlockSpec((tm, 1), lambda i, j: (i, 0)),       # row labels
                pl.BlockSpec((1, tn), lambda i, j: (0, j)),       # col labels
                pl.BlockSpec((tm, D_pad), lambda i, j: (i, 0)),   # row features
                pl.BlockSpec((tn, D_pad), lambda i, j: (j, 0)),   # col features
            ],
            out_specs=pl.BlockSpec((tm, 1), lambda i, j: (i, 0)),
            scratch_shapes=[
                pltpu.VMEM((tm, D_pad), jnp.bfloat16),   # cached scaled rows
                pltpu.VMEM((tm, 1), jnp.float32),        # running max
                pltpu.VMEM((tm, 1), jnp.float32),        # running sum-exp
                pltpu.VMEM((tm, 1), jnp.float32),        # positive logit
            ],
        ),
        compiler_params=pltpu.CompilerParams(
            dimension_semantics=("parallel", "arbitrary"),
            vmem_limit_bytes=48 * 1024 * 1024,
        ),
    )(lab_rows, lab_cols, f, f)

    # CrossEntropyLoss(target=0, reduction='mean') over the valid rows.
    return jnp.sum(per_row[:N, 0]) / N


def _torch_style_reference(features, labels, temperature):
    """NumPy re-implementation following the torch code path (mask + view)."""
    f = np.asarray(features, dtype=np.float64)
    y = np.asarray(labels)
    N = f.shape[0]
    onehot = np.eye(int(y.max()) + 1, dtype=np.float64)[y]
    lab = onehot @ onehot.T
    fn = f / np.maximum(np.linalg.norm(f, axis=1, keepdims=True), 1e-12)
    sim = fn @ fn.T
    mask = np.eye(N, dtype=bool)
    lab = lab[~mask].reshape(N, -1)
    sim = sim[~mask].reshape(N, -1)
    pos = sim[lab.astype(bool)].reshape(N, -1)
    neg = sim[~lab.astype(bool)].reshape(N, -1)
    logits = np.concatenate([pos, neg], axis=1) / temperature
    m = logits.max(axis=1, keepdims=True)
    lse = m[:, 0] + np.log(np.exp(logits - m).sum(axis=1))
    return float(np.mean(lse - logits[:, 0]))


if __name__ == "__main__":
    key = jax.random.PRNGKey(0)
    temperature = 0.07
    k1, k2 = jax.random.split(key)

    # Small 2-view SimCLR batch (single tile path).
    N1, D1 = 8, 32
    feats1 = jax.random.normal(k1, (N1, D1), dtype=jnp.float32)
    labels1 = jnp.array([0, 1, 2, 3, 0, 1, 2, 3], dtype=jnp.int32)
    loss1 = simclr_loss(feats1, labels1, temperature)
    jax.block_until_ready(loss1)
    ref1 = _torch_style_reference(feats1, labels1, temperature)
    # Tolerance accounts for bf16 MXU operands (f32 accumulation).
    assert abs(float(loss1) - ref1) <= 3e-2 + 2e-2 * abs(ref1), (float(loss1), ref1)

    # Larger 2-view batch exercising the multi-tile + padding path
    # (N=384 -> padded to 512, 2x2 grid of 256-tiles).
    N2, D2 = 384, 64
    feats2 = jax.random.normal(k2, (N2, D2), dtype=jnp.float32)
    labels2 = jnp.tile(jnp.arange(N2 // 2, dtype=jnp.int32), 2)
    loss2 = simclr_loss(feats2, labels2, temperature)
    jax.block_until_ready(loss2)
    ref2 = _torch_style_reference(feats2, labels2, temperature)
    assert abs(float(loss2) - ref2) <= 3e-2 + 2e-2 * abs(ref2), (float(loss2), ref2)

    print("KERNEL_OK")
</pallas_src>

<mosaic_0001>
module attributes {stable_mosaic.version = 11 : i64} {
  func.func @_simclr_kernel(%arg0: i32, %arg1: i32, %arg2: memref<8x1xi32, #tpu.memory_space<vmem>>, %arg3: memref<1x8xi32, #tpu.memory_space<vmem>>, %arg4: memref<8x128xf32, #tpu.memory_space<vmem>>, %arg5: memref<8x128xf32, #tpu.memory_space<vmem>>, %arg6: memref<8x1xf32, #tpu.memory_space<vmem>>, %arg7: memref<8x128xbf16, #tpu.memory_space<vmem>>, %arg8: memref<8x1xf32, #tpu.memory_space<vmem>>, %arg9: memref<8x1xf32, #tpu.memory_space<vmem>>, %arg10: memref<8x1xf32, #tpu.memory_space<vmem>>) attributes {dimension_semantics = [#tpu.dimension_semantics<parallel>, #tpu.dimension_semantics<arbitrary>], iteration_bounds = array<i64: 1, 1>, scalar_prefetch = 0 : i64, scratch_operands = 4 : i64, tpu.core_type = #tpu.core_type<tc>, window_params = [{transform_indices = @transform_0, window_bounds = array<i64: 8, 1>}, {transform_indices = @transform_1, window_bounds = array<i64: 1, 8>}, {transform_indices = @transform_2, window_bounds = array<i64: 8, 128>}, {transform_indices = @transform_3, window_bounds = array<i64: 8, 128>}, {transform_indices = @transform_4, window_bounds = array<i64: 8, 1>}]} {
    %c0_i32 = arith.constant 0 : i32
    %0 = arith.cmpi eq, %arg1, %c0_i32 : i32
    %1 = arith.extui %0 : i1 to i32
    %cst = arith.constant -1.000000e+30 : f32
    %c0_i32_0 = arith.constant 0 : i32
    %2 = arith.cmpi ne, %1, %c0_i32_0 : i32
    scf.if %2 {
      %c0_32 = arith.constant 0 : index
      %c0_33 = arith.constant 0 : index
      %61 = vector.load %arg4[%c0_32, %c0_33] : memref<8x128xf32, #tpu.memory_space<vmem>>, vector<8x128xf32>
      %62 = arith.mulf %61, %61 : vector<8x128xf32>
      %cst_34 = arith.constant dense<0.000000e+00> : vector<8xf32>
      %63 = vector.multi_reduction <add>, %62, %cst_34 [1] : vector<8x128xf32> to vector<8xf32>
      %64 = vector.shape_cast %63 : vector<8xf32> to vector<8x1xf32>
      %cst_35 = arith.constant 1.000000e-24 : f32
      %65 = vector.broadcast %cst_35 : f32 to vector<8x1xf32>
      %66 = arith.maximumf %64, %65 : vector<8x1xf32>
      %67 = math.rsqrt %66 : vector<8x1xf32>
      %cst_36 = arith.constant 14.2857141 : f32
      %68 = vector.broadcast %cst_36 : f32 to vector<8x1xf32>
      %69 = arith.mulf %67, %68 : vector<8x1xf32>
      %70 = vector.broadcast %69 : vector<8x1xf32> to vector<8x128xf32>
      %71 = arith.mulf %61, %70 : vector<8x128xf32>
      %72 = arith.truncf %71 : vector<8x128xf32> to vector<8x128xbf16>
      %c0_37 = arith.constant 0 : index
      %c0_38 = arith.constant 0 : index
      %73 = vector.load %arg7[%c0_37, %c0_38] : memref<8x128xbf16, #tpu.memory_space<vmem>>, vector<8x128xbf16>
      tpu.vector_store %arg7[%c0_37, %c0_38], %72 {strides = array<i32>} : memref<8x128xbf16, #tpu.memory_space<vmem>>, vector<8x128xbf16>,
      %74 = vector.broadcast %cst : f32 to vector<8x1xf32>
      %c0_39 = arith.constant 0 : index
      %c0_40 = arith.constant 0 : index
      %75 = vector.load %arg8[%c0_39, %c0_40] : memref<8x1xf32, #tpu.memory_space<vmem>>, vector<8x1xf32>
      tpu.vector_store %arg8[%c0_39, %c0_40], %74 {strides = array<i32>} : memref<8x1xf32, #tpu.memory_space<vmem>>, vector<8x1xf32>,
      %cst_41 = arith.constant 0.000000e+00 : f32
      %76 = vector.broadcast %cst_41 : f32 to vector<8x1xf32>
      %c0_42 = arith.constant 0 : index
      %c0_43 = arith.constant 0 : index
      %77 = vector.load %arg9[%c0_42, %c0_43] : memref<8x1xf32, #tpu.memory_space<vmem>>, vector<8x1xf32>
      tpu.vector_store %arg9[%c0_42, %c0_43], %76 {strides = array<i32>} : memref<8x1xf32, #tpu.memory_space<vmem>>, vector<8x1xf32>,
      %cst_44 = arith.constant 0.000000e+00 : f32
      %78 = vector.broadcast %cst_44 : f32 to vector<8x1xf32>
      %c0_45 = arith.constant 0 : index
      %c0_46 = arith.constant 0 : index
      %79 = vector.load %arg10[%c0_45, %c0_46] : memref<8x1xf32, #tpu.memory_space<vmem>>, vector<8x1xf32>
      tpu.vector_store %arg10[%c0_45, %c0_46], %78 {strides = array<i32>} : memref<8x1xf32, #tpu.memory_space<vmem>>, vector<8x1xf32>,
    } else {
    }
    %c0 = arith.constant 0 : index
    %c0_1 = arith.constant 0 : index
    %3 = vector.load %arg5[%c0, %c0_1] : memref<8x128xf32, #tpu.memory_space<vmem>>, vector<8x128xf32>
    %4 = arith.mulf %3, %3 : vector<8x128xf32>
    %cst_2 = arith.constant dense<0.000000e+00> : vector<8xf32>
    %5 = vector.multi_reduction <add>, %4, %cst_2 [1] : vector<8x128xf32> to vector<8xf32>
    %6 = vector.shape_cast %5 : vector<8xf32> to vector<8x1xf32>
    %cst_3 = arith.constant 1.000000e-24 : f32
    %7 = vector.broadcast %cst_3 : f32 to vector<8x1xf32>
    %8 = arith.maximumf %6, %7 : vector<8x1xf32>
    %9 = math.rsqrt %8 : vector<8x1xf32>
    %10 = vector.broadcast %9 : vector<8x1xf32> to vector<8x128xf32>
    %11 = arith.mulf %3, %10 : vector<8x128xf32>
    %12 = arith.truncf %11 : vector<8x128xf32> to vector<8x128xbf16>
    %c0_4 = arith.constant 0 : index
    %c0_5 = arith.constant 0 : index
    %13 = vector.load %arg7[%c0_4, %c0_5] : memref<8x128xbf16, #tpu.memory_space<vmem>>, vector<8x128xbf16>
    %cst_6 = arith.constant dense<0.000000e+00> : vector<8x8xf32>
    %14 = tpu.matmul %13, %12, %cst_6 {dimension_numbers = #tpu.dot_dimension_numbers<[1], [1], [0], [0], [0, 0, 1, 0], [], []>} : vector<8x128xbf16>, vector<8x128xbf16>, vector<8x8xf32> -> vector<8x8xf32>
    %c8_i32 = arith.constant 8 : i32
    %15 = arith.muli %arg0, %c8_i32 : i32
    %16 = tpu.iota {dimensions = array<i32: 0>} : vector<8x8xi32>
    %17 = vector.broadcast %15 : i32 to vector<8x8xi32>
    %18 = arith.addi %17, %16 : vector<8x8xi32>
    %c8_i32_7 = arith.constant 8 : i32
    %19 = arith.muli %arg1, %c8_i32_7 : i32
    %20 = tpu.iota {dimensions = array<i32: 1>} : vector<8x8xi32>
    %21 = vector.broadcast %19 : i32 to vector<8x8xi32>
    %22 = arith.addi %21, %20 : vector<8x8xi32>
    %23 = arith.cmpi ne, %18, %22 : vector<8x8xi32>
    %c8_i32_8 = arith.constant 8 : i32
    %24 = vector.broadcast %c8_i32_8 : i32 to vector<8x8xi32>
    %25 = arith.cmpi slt, %22, %24 : vector<8x8xi32>
    %26 = arith.andi %23, %25 : vector<8x8xi1>
    %c0_9 = arith.constant 0 : index
    %c0_10 = arith.constant 0 : index
    %27 = vector.load %arg2[%c0_9, %c0_10] : memref<8x1xi32, #tpu.memory_space<vmem>>, vector<8x1xi32>
    %c0_11 = arith.constant 0 : index
    %c0_12 = arith.constant 0 : index
    %28 = vector.load %arg3[%c0_11, %c0_12] : memref<1x8xi32, #tpu.memory_space<vmem>>, vector<1x8xi32>
    %29 = vector.broadcast %27 : vector<8x1xi32> to vector<8x8xi32>
    %30 = vector.broadcast %28 : vector<1x8xi32> to vector<8x8xi32>
    %31 = arith.cmpi eq, %29, %30 : vector<8x8xi32>
    %32 = arith.andi %31, %26 : vector<8x8xi1>
    %c0_13 = arith.constant 0 : index
    %c0_14 = arith.constant 0 : index
    %33 = vector.load %arg10[%c0_13, %c0_14] : memref<8x1xf32, #tpu.memory_space<vmem>>, vector<8x1xf32>
    %cst_15 = arith.constant 0.000000e+00 : f32
    %34 = vector.broadcast %cst_15 : f32 to vector<8x8xf32>
    %35 = arith.select %32, %14, %34 : vector<8x8xi1>, vector<8x8xf32>
    %cst_16 = arith.constant dense<0.000000e+00> : vector<8xf32>
    %36 = vector.multi_reduction <add>, %35, %cst_16 [1] : vector<8x8xf32> to vector<8xf32>
    %37 = vector.shape_cast %36 : vector<8xf32> to vector<8x1xf32>
    %38 = arith.addf %33, %37 : vector<8x1xf32>
    %c0_17 = arith.constant 0 : index
    %c0_18 = arith.constant 0 : index
    %39 = vector.load %arg10[%c0_17, %c0_18] : memref<8x1xf32, #tpu.memory_space<vmem>>, vector<8x1xf32>
    tpu.vector_store %arg10[%c0_17, %c0_18], %38 {strides = array<i32>} : memref<8x1xf32, #tpu.memory_space<vmem>>, vector<8x1xf32>,
    %cst_19 = arith.constant -1.000000e+30 : f32
    %40 = vector.broadcast %cst_19 : f32 to vector<8x8xf32>
    %41 = arith.select %26, %14, %40 : vector<8x8xi1>, vector<8x8xf32>
    %c0_20 = arith.constant 0 : index
    %c0_21 = arith.constant 0 : index
    %42 = vector.load %arg8[%c0_20, %c0_21] : memref<8x1xf32, #tpu.memory_space<vmem>>, vector<8x1xf32>
    %cst_22 = arith.constant dense<0xFF800000> : vector<8xf32>
    %43 = vector.multi_reduction <maximumf>, %41, %cst_22 [1] : vector<8x8xf32> to vector<8xf32>
    %44 = vector.shape_cast %43 : vector<8xf32> to vector<8x1xf32>
    %45 = arith.maximumf %42, %44 : vector<8x1xf32>
    %c0_23 = arith.constant 0 : index
    %c0_24 = arith.constant 0 : index
    %46 = vector.load %arg9[%c0_23, %c0_24] : memref<8x1xf32, #tpu.memory_space<vmem>>, vector<8x1xf32>
    %47 = arith.subf %42, %45 : vector<8x1xf32>
    %48 = math.exp %47 : vector<8x1xf32>
    %49 = arith.mulf %46, %48 : vector<8x1xf32>
    %50 = vector.broadcast %45 : vector<8x1xf32> to vector<8x8xf32>
    %51 = arith.subf %41, %50 : vector<8x8xf32>
    %52 = math.exp %51 : vector<8x8xf32>
    %cst_25 = arith.constant dense<0.000000e+00> : vector<8xf32>
    %53 = vector.multi_reduction <add>, %52, %cst_25 [1] : vector<8x8xf32> to vector<8xf32>
    %54 = vector.shape_cast %53 : vector<8xf32> to vector<8x1xf32>
    %55 = arith.addf %49, %54 : vector<8x1xf32>
    %c0_26 = arith.constant 0 : index
    %c0_27 = arith.constant 0 : index
    %56 = vector.load %arg9[%c0_26, %c0_27] : memref<8x1xf32, #tpu.memory_space<vmem>>, vector<8x1xf32>
    tpu.vector_store %arg9[%c0_26, %c0_27], %55 {strides = array<i32>} : memref<8x1xf32, #tpu.memory_space<vmem>>, vector<8x1xf32>,
    %c0_28 = arith.constant 0 : index
    %c0_29 = arith.constant 0 : index
    %57 = vector.load %arg8[%c0_28, %c0_29] : memref<8x1xf32, #tpu.memory_space<vmem>>, vector<8x1xf32>
    tpu.vector_store %arg8[%c0_28, %c0_29], %45 {strides = array<i32>} : memref<8x1xf32, #tpu.memory_space<vmem>>, vector<8x1xf32>,
    %c0_i32_30 = arith.constant 0 : i32
    %58 = arith.cmpi eq, %arg1, %c0_i32_30 : i32
    %59 = arith.extui %58 : i1 to i32
    %c0_i32_31 = arith.constant 0 : i32
    %60 = arith.cmpi ne, %59, %c0_i32_31 : i32
    scf.if %60 {
      %c0_32 = arith.constant 0 : index
      %c0_33 = arith.constant 0 : index
      %61 = vector.load %arg8[%c0_32, %c0_33] : memref<8x1xf32, #tpu.memory_space<vmem>>, vector<8x1xf32>
      %c0_34 = arith.constant 0 : index
      %c0_35 = arith.constant 0 : index
      %62 = vector.load %arg9[%c0_34, %c0_35] : memref<8x1xf32, #tpu.memory_space<vmem>>, vector<8x1xf32>
      %63 = math.log %62 : vector<8x1xf32>
      %64 = arith.addf %61, %63 : vector<8x1xf32>
      %c0_36 = arith.constant 0 : index
      %c0_37 = arith.constant 0 : index
      %65 = vector.load %arg10[%c0_36, %c0_37] : memref<8x1xf32, #tpu.memory_space<vmem>>, vector<8x1xf32>
      %66 = arith.subf %64, %65 : vector<8x1xf32>
      %c0_38 = arith.constant 0 : index
      %c0_39 = arith.constant 0 : index
      %67 = vector.load %arg6[%c0_38, %c0_39] : memref<8x1xf32, #tpu.memory_space<vmem>>, vector<8x1xf32>
      tpu.vector_store %arg6[%c0_38, %c0_39], %66 {strides = array<i32>} : memref<8x1xf32, #tpu.memory_space<vmem>>, vector<8x1xf32>,
    } else {
    }
    return
  }
  func.func @transform_0(%arg0: i32, %arg1: i32) -> (i32, i32) {
    %c0_i32 = arith.constant 0 : i32
    %c0_i32_0 = arith.constant 0 : i32
    return %arg0, %c0_i32 : i32, i32
  }
  func.func @transform_1(%arg0: i32, %arg1: i32) -> (i32, i32) {
    %c0_i32 = arith.constant 0 : i32
    %c0_i32_0 = arith.constant 0 : i32
    return %c0_i32, %arg1 : i32, i32
  }
  func.func @transform_2(%arg0: i32, %arg1: i32) -> (i32, i32) {
    %c0_i32 = arith.constant 0 : i32
    %c0_i32_0 = arith.constant 0 : i32
    return %arg0, %c0_i32 : i32, i32
  }
  func.func @transform_3(%arg0: i32, %arg1: i32) -> (i32, i32) {
    %c0_i32 = arith.constant 0 : i32
    %c0_i32_0 = arith.constant 0 : i32
    return %arg1, %c0_i32 : i32, i32
  }
  func.func @transform_4(%arg0: i32, %arg1: i32) -> (i32, i32) {
    %c0_i32 = arith.constant 0 : i32
    %c0_i32_0 = arith.constant 0 : i32
    return %arg0, %c0_i32 : i32, i32
  }
}

</mosaic_0001>

<bundles_post_ra>
// kernel: tpu_custom_call.1
= control target key start
LH: loop header
LB: loop body
LE: loop exit
PB: predicated region body
PF: predicated region fallthrough
CT: control target
= control target key end

     0   :  { %9 = vsyncpa [#allocation7], 0  ;;  %s221_s15 = smov [#allocation6]   ;;  %s285_s0 = inlined_call_operand.vmem [shape: s32[8,1], index: 0, kind: input, shape index: {}]   ;;  %s286_s1 = inlined_call_operand.hbm [shape: s32[1,8], index: 1, kind: input, shape index: {}]   ;;  %s287_s2 = inlined_call_operand.vmem [shape: f32[8,128], index: 2, kind: input, shape index: {}]   ;;  %s288_s3 = inlined_call_operand.vmem [shape: f32[8,128], index: 3, kind: input, shape index: {}]   ;;  %s289_s4 = inlined_call_operand.vmem [shape: f32[8,1], index: 4, kind: output, shape index: {}]  }
   0x1   :  { %s18_s16 = sshll.u32 %s221_s15, 4  ;;  %s197_s19 = scalar_lea.hbm %s286_s1, 16  ;;  %s19_s16 = int_to_ptr.vmem [resolvable:$true] %s18_s16 }
   0x2   :  { %p198_p0 = scmp.ne.s32.totalorder %s286_s1, %s197_s19  ;;  %p201_p1 = scmp.lt.u32.totalorder %s197_s19, %s286_s1 }
   0x4   :  { %p203_p2 = pnand %p201_p1, %p198_p0 }
   0x6   :  { %206 = shalt.err (!%p203_p2)
}
   0x7   :  { %s207_s24 = scalar_lea.vmem %s19_s16, 16  ;;  %s211_s25 = scalar_lea.vmem %s19_s16, 32 }
   0x8   :  { %p208_p3 = scmp.ne.s32.totalorder %s19_s16, %s207_s24  ;;  %p212_p4 = scmp.lt.s32.totalorder %s19_s16, %s19_s16 }
   0x9   :  { %p213_p5 = scmp.lt.s32.totalorder %s211_s25, %s207_s24 }
   0xb   :  { %p214_p6 = por %p213_p5, %p212_p4 }
   0xd   :  { %p215_p7 = pnand %p214_p6, %p208_p3 }
   0xf   :  { %218 = shalt.err (!%p215_p7)
}
  0x10   :  { %21 = dma.hbm_to_vmem [thread:$0]  %s286_s1, 16, %s19_s16, [#allocation7]  }
  0x11   :  { %219 = dma.done.wait [#allocation7], 16  }
  0x12   :  { %220 = vsyncadd [#allocation7], 4294967280  ;;  %v34_v0 = vld [vmem:[%s287_s2] sm:$0xff]  ;;  %vm44_vm0 = vcmask 7168   ;;  %v222_v4 = vmov 0.0   ;;  %vm223_vm1 = vmmov 0   ;;  %v98_v20 = vlaneseq }
  0x13   :  { %v48_v1 = vld [vmem:[%s288_s3] sm:$0xff]  ;;  %v35_v2 = vmul.f32 %v34_v0, %v34_v0  ;;  %46 = vst.msk [vmem:[#allocation4] sm:$0xff] %vm44_vm0, %v222_v4  ;;  %47 = vst.msk [vmem:[#allocation5] sm:$0xff] %vm44_vm0, %v222_v4  ;;  %174 = vmatprep.subr.bf16.mxu0 %v222_v4  ;;  %176 = vmatprep.mubr.msk.bf16.mxu0 %vm223_vm1, %v222_v4  ;;  %v224_v6 = vmov 0   ;;  %v225_v19 = vmov -1e+30  }
  0x14   :  { %v49_v3 = vmul.f32 %v48_v1, %v48_v1  ;;  %v110_v5 = vld [vmem:[%s285_s0] sm:$0xff]  ;;  %186 = vset.pattern.permute.xlu0 %v224_v6  ;;  %185 = vset.pattern.permute.xlu1 %v224_v6  ;;  %45 = vst.msk [vmem:[#allocation3] sm:$0xff] %vm44_vm0, %v225_v19  ;;  %v99_v21 = vshrl.u32 %v98_v20, 7  ;;  %v104_v22 = vand.u32 127, %v98_v20  ;;  %v171_v23 = vld [vmem:[#allocation6] ss:$0 sm:$0xff] }
  0x15   :  { %36 = vadd.xlane.f32.xlu0 %v35_v2  ;;  %vm123_vm7 = vcmask 64512  }
  0x16   :  { %vm107_vm2 = vcmp.ne.s32.totalorder %v99_v21, %v104_v22  ;;  %vm108_vm3 = vcmp.lt.s32.totalorder %v104_v22, 8 }
  0x17   :  { %vm109_vm4 = vmand %vm107_vm2, %vm108_vm3 }
  0x19   :  { %50 = vadd.xlane.f32.xlu0 %v49_v3 }
  0x1a   :  { %v121_v34 = vld [vmem:[#allocation5] sm:$0xff]  ;;  %v136_v47 = vld [vmem:[#allocation4] sm:$0xff] }
  0x1b   :  { %v131_v33 = vld [vmem:[#allocation3] sm:$0xff] }
  0x2f   :  { %113 = vperm.xlu0 %186, %v110_v5  }
  0xa2   :  { %v37_v7 = vpop.xlane.xlu0 %36 }
  0xa3   :  { %v38_v8 = vmax.f32 %v37_v7, 1e-24 }
  0xa5   :  { %187 = vrsqrt.f32 %v38_v8 }
  0xa6   :  { %v51_v9 = vpop.xlane.xlu0 %50 }
  0xa7   :  { %v52_v10 = vmax.f32 %v51_v9, 1e-24 }
  0xa9   :  { %189 = vrsqrt.f32 %v52_v10 }
  0xae   :  { %v114_v24 = vpop.permute.xlu0 %113 }
  0xaf   :  { %v188_v11 = vpop.eup %187  ;;  %vm119_vm5 = vcmp.eq.s32.totalorder %v114_v24, %v171_v23 }
  0xb0   :  { %v40_v12 = vmul.f32 14.285714, %v188_v11  ;;  %vm120_vm6 = vmand %vm119_vm5, %vm109_vm4 }
  0xb2   :  { %v41_v13 = vmul.f32 %v40_v12, %v34_v0 }
  0xb3   :  { %v190_v14 = vpop.eup %189 }
  0xb4   :  { %v42_v15 = vpack.c.bf16 %v41_v13, %v41_v13  ;;  %v54_v16 = vmul.f32 %v190_v14, %v48_v1 }
  0xb6   :  { %43 = vst [vmem:[#allocation2] sm:$0xf] %v42_v15  ;;  %v55_v17 = vpack.c.bf16 %v54_v16, %v54_v16 }
  0xb8   :  { %175 = vmatpush3.bf16.xpose.msra.mxu0 %v55_v17 }
  0xbd   :  { %v56_v18 = vld [vmem:[#allocation2] sm:$0xf] }
  0xbf   :  { %177 = vmatmul.mubr.bf16.vlgmr.msra.gmra.mrb[0].mxu0 %v56_v18 }
 0x192   :  { %v91_v25 = vpop.f32.mrb[0].mxu0 }
 0x193   :  { %v178_v26 = vpop.f32.mrb[1].mxu0  ;;  %v130_v27 = vsel %vm109_vm4, %v91_v25, -1e+30  ;;  %v122_v28 = vsel %vm120_vm6, %v91_v25, 0.0 }
 0x194   :  { %v94_v29 = vpop.f32.mrb[2].mxu0  ;;  %v132_v30 = vsel %vm123_vm7, %v130_v27, -inf  ;;  %v124_v31 = vsel %vm123_vm7, %v122_v28, 0.0 }
 0x195   :  { %133 = vmax.xlane.f32.xlu1 %v132_v30  ;;  %v179_v32 = vpop.f32.mrb[3].mxu0  ;;  %125 = vadd.xlane.f32.xlu0 %v124_v31 }
 0x222   :  { %v134_v35 = vpop.xlane.xlu1 %133  ;;  %v126_v36 = vpop.xlane.xlu0 %125 }
 0x223   :  { %v135_v37 = vmax.f32 %v131_v33, %v134_v35  ;;  %v127_v38 = vadd.f32 %v126_v36, %v121_v34 }
 0x225   :  { %v137_v39 = vsub.f32 %v131_v33, %v135_v37  ;;  %154 = vst.msk [vmem:[#allocation3] sm:$0xff] %vm44_vm0, %v135_v37  ;;  %129 = vst.msk [vmem:[#allocation5] sm:$0xff] %vm44_vm0, %v127_v38  ;;  %143 = vperm.xlu1 %185, %v135_v37  }
 0x227   :  { %v138_v45 = vmul.f32 1.442695, %v137_v39 }
 0x22c   :  { %v158_v54 = vld [vmem:[#allocation3] sm:$0xff]  ;;  %v163_v56 = vld [vmem:[#allocation5] sm:$0xff] }
 0x2a4   :  { %v144_v40 = vpop.permute.xlu1 %143 }
 0x2a5   :  { %v146_v41 = vsub.f32 %v130_v27, %v144_v40 }
 0x2a7   :  { %v147_v42 = vmul.f32 1.442695, %v146_v41 }
 0x2a9   :  { %191 = vpow2.f32 %v147_v42 }
 0x2aa   :  { %193 = vpow2.f32 %v138_v45 }
 0x2b3   :  { %v192_v43 = vpop.eup %191 }
 0x2b4   :  { %v149_v44 = vsel %vm123_vm7, %v192_v43, 0.0  ;;  %v194_v46 = vpop.eup %193 }
 0x2b5   :  { %150 = vadd.xlane.f32.xlu1 %v149_v44  ;;  %v140_v48 = vmul.f32 %v194_v46, %v136_v47 }
 0x342   :  { %v151_v49 = vpop.xlane.xlu1 %150 }
 0x343   :  { %v152_v50 = vadd.f32 %v151_v49, %v140_v48 }
 0x345   :  { %153 = vst.msk [vmem:[#allocation4] sm:$0xff] %vm44_vm0, %v152_v50 }
 0x34c   :  { %v159_v51 = vld [vmem:[#allocation4] sm:$0xff] }
 0x34d   :  { %195 = vlog2.f32 %v159_v51 }
 0x357   :  { %v196_v52 = vpop.eup %195 }
 0x358   :  { %v161_v53 = vmul.f32 0.6931472, %v196_v52 }
 0x35a   :  { %v162_v55 = vadd.f32 %v161_v53, %v158_v54 }
 0x35c   :  { %v164_v57 = vsub.f32 %v162_v55, %v163_v56 }
 0x35e   :  { %165 = vst.msk [vmem:[%s289_s4] sm:$0xff] %vm44_vm0, %v164_v57 }
 0x35f   :  { %170 = vsyncpa [#allocation7], 1 }

</bundles_post_ra>
